<compile_context>
chip_gen: v5e
topology: v5e:2x2
jax: 0.10.0
libtpu: 0.0.40
codegen_flags: <defaults>
</compile_context>

<pallas_src>
import functools

import jax
import jax.numpy as jnp
from jax import lax
from jax.experimental import pallas as pl
from jax.experimental.pallas import tpu as pltpu

_BIG = 1e9          # "infinity" for f32 cost maps
_BIG_THRESH = 1e8   # anything >= this is treated as unreachable / no-open
_IBIG = 2 ** 30     # "infinity" for int32 linear indices


def _floordiv_const(x, d):
    """Floor-divide non-negative int32 `x` by static positive int `d`.

    Uses an exact float32 trick (valid for x < 2**23) to avoid relying on
    vector integer division support in the TPU lowering.
    """
    return jnp.floor((x.astype(jnp.float32) + 0.5) * (1.0 / float(d))).astype(jnp.int32)


def _hybrid_astar_kernel(w_ref, h_ref, s_ref, t_ref, paths_ref, exp_ref, *, H, W):
    n = H * W
    w = w_ref[0]      # (1, n) cost of entering each cell
    h = h_ref[0]      # (1, n) heuristic
    src = s_ref[0]    # (1, n) one-hot source
    tgt = t_ref[0]    # (1, n) one-hot target

    # Flattened linear / row / col index maps (hoisted; computed once).
    lin1 = lax.broadcasted_iota(jnp.int32, (1, n), 1)
    row1 = _floordiv_const(lin1, W)
    col1 = lin1 - row1 * W

    src_lin = jnp.min(jnp.where(src > 0.5, lin1, _IBIG))   # scalar int32
    tgt_lin = jnp.min(jnp.where(tgt > 0.5, lin1, _IBIG))   # scalar int32

    # ---- fused A* search: map 0 = Dijkstra (h == 0, BBAStar paths),
    #                       map 1 = heuristic search (NeuralAStar exp_nodes).
    is_nn = lax.broadcasted_iota(jnp.int32, (2, n), 0) > 0          # (2, n) bool
    wS = jnp.broadcast_to(w, (2, n))
    hS = jnp.where(is_nn, h, 0.0)                                   # (2, n)

    g_src = jnp.where(src > 0.5, jnp.zeros_like(src), jnp.full_like(src, _BIG))
    g0 = jnp.broadcast_to(g_src, (2, n))
    opn0 = jnp.broadcast_to(src, (2, n))
    closed0 = jnp.zeros_like(g0)
    done0 = jnp.zeros_like(g0[:, :1])          # (2, 1) f32: 0 = still searching
    alldone0 = jnp.min(done0)                  # scalar f32
    it0 = tgt_lin * 0                          # scalar int32 zero (tracer-derived)
    n_cap = n + 1

    def search_cond(carry):
        _, _, _, _, alldone, it = carry
        return jnp.logical_and(it < n_cap, alldone < 0.5)

    def search_body(carry):
        g, opn, closed, done, _, it = carry

        f = jnp.where(opn > 0.5, g + hS, _BIG)
        fmin = jnp.min(f, axis=-1, keepdims=True)                         # (2, 1)
        has_open = fmin < _BIG_THRESH                                     # (2, 1)
        imin = jnp.min(jnp.where(f <= fmin, lin1, _IBIG),
                       axis=-1, keepdims=True)                            # (2, 1)
        sel = lin1 == imin                                                # (2, n)
        hit = imin == tgt_lin                                             # (2, 1)

        running = done < 0.5
        active = jnp.logical_and(running, has_open)                       # (2, 1)

        # g at the popped cell.
        g_sel = jnp.sum(jnp.where(sel, g, 0.0), axis=-1, keepdims=True)   # (2, 1)

        # 8-neighborhood of the popped cell via index arithmetic (no shifts).
        sel_r = _floordiv_const(imin, W)
        sel_c = imin - sel_r * W
        nb = jnp.logical_and(jnp.abs(row1 - sel_r) <= 1,
                             jnp.abs(col1 - sel_c) <= 1)                  # (2, n)

        cand = g_sel + wS
        sel_active = jnp.logical_and(sel, active)
        improve = (nb & jnp.logical_not(sel) & (closed < 0.5)
                   & (cand < g) & active)

        g = jnp.where(improve, cand, g)
        opn = jnp.where(improve, jnp.ones_like(opn),
                        jnp.where(sel_active, jnp.zeros_like(opn), opn))
        closed = jnp.where(sel_active, jnp.ones_like(closed), closed)

        newly_done = jnp.logical_or(jnp.logical_and(active, hit),
                                    jnp.logical_not(has_open))
        done = jnp.maximum(done, newly_done.astype(done.dtype))
        return g, opn, closed, done, jnp.min(done), it + 1

    g_fin, _, closed_fin, _, _, _ = lax.while_loop(
        search_cond, search_body, (g0, opn0, closed0, done0, alldone0, it0))

    g_bb = g_fin[0:1]            # Dijkstra cost-to-come (for path backtracking)
    exp_nodes = closed_fin[1:2]  # expanded nodes of the heuristic search

    # ---- backtrack: steepest descent on g_bb from target back to source.
    path0 = tgt
    cur0 = tgt_lin
    bdone0 = (tgt_lin < 0).astype(jnp.float32)   # scalar 0.0 (tracer-derived)

    def bt_cond(carry):
        _, _, done, it = carry
        return jnp.logical_and(it < n_cap, done < 0.5)

    def bt_body(carry):
        cur, path, done, it = carry
        at_src = cur == src_lin
        done = jnp.maximum(done, at_src.astype(done.dtype))
        run = done < 0.5

        cur_r = _floordiv_const(cur, W)
        cur_c = cur - cur_r * W
        nb = ((jnp.abs(row1 - cur_r) <= 1) & (jnp.abs(col1 - cur_c) <= 1)
              & (lin1 != cur))
        g_nb = jnp.where(nb, g_bb, _BIG)
        gmin = jnp.min(g_nb)
        stuck = gmin >= _BIG_THRESH              # guard: target unreachable
        nxt = jnp.min(jnp.where(g_nb <= gmin, lin1, _IBIG))

        step = jnp.logical_and(run, jnp.logical_not(stuck))
        path = jnp.where(jnp.logical_and(step, lin1 == nxt),
                         jnp.ones_like(path), path)
        cur = jnp.where(step, nxt, cur)
        done = jnp.maximum(done, jnp.logical_and(run, stuck).astype(done.dtype))
        return cur, path, done, it + 1

    _, path_fin, _, _ = lax.while_loop(bt_cond, bt_body, (cur0, path0, bdone0, it0))

    paths_ref[0] = path_fin
    exp_ref[0] = exp_nodes


@functools.partial(jax.jit, static_argnames=("detach",))
def hybrid_a_star(weights, heuristic, source, target, detach=True):
    """Returns (paths, exp_nodes), each shaped like the inputs (B, 1, H, W)."""
    B, C, H, W = weights.shape
    assert C == 1, "cost/heuristic/source/target maps are single-channel"
    n = H * W
    # `detach` only affects gradients (stop-gradient into the NeuralAStar branch);
    # forward values are identical, so it is accepted for API parity only.
    del detach

    # Flatten spatial dims so the kernel works on a lane-dense (1, H*W) layout.
    w2 = weights.reshape(B, 1, n).astype(jnp.float32)
    h2 = heuristic.reshape(B, 1, n).astype(jnp.float32)
    s2 = source.reshape(B, 1, n).astype(jnp.float32)
    t2 = target.reshape(B, 1, n).astype(jnp.float32)

    spec = pl.BlockSpec((1, 1, n), lambda b: (b, 0, 0))
    out_shape = (
        jax.ShapeDtypeStruct((B, 1, n), jnp.float32),
        jax.ShapeDtypeStruct((B, 1, n), jnp.float32),
    )
    kernel = functools.partial(_hybrid_astar_kernel, H=H, W=W)
    paths, exp_nodes = pl.pallas_call(
        kernel,
        out_shape=out_shape,
        grid=(B,),
        in_specs=[spec, spec, spec, spec],
        out_specs=(spec, spec),
        compiler_params=pltpu.CompilerParams(
            dimension_semantics=("parallel",),
        ),
    )(w2, h2, s2, t2)
    return paths.reshape(B, C, H, W), exp_nodes.reshape(B, C, H, W)


if __name__ == "__main__":
    B, C, H, W = 2, 1, 16, 16
    key = jax.random.PRNGKey(0)
    k_w, k_h = jax.random.split(key)

    # Positive traversal costs (obstacle-like cost map) and a non-negative heuristic.
    weights = jax.random.uniform(k_w, (B, C, H, W), jnp.float32, 0.5, 2.0)
    heuristic = jax.random.uniform(k_h, (B, C, H, W), jnp.float32, 0.0, 4.0)

    source = jnp.zeros((B, C, H, W), jnp.float32)
    target = jnp.zeros((B, C, H, W), jnp.float32)
    source = source.at[0, 0, 1, 1].set(1.0).at[1, 0, 2, 3].set(1.0)
    target = target.at[0, 0, 14, 13].set(1.0).at[1, 0, 12, 15].set(1.0)

    paths, exp_nodes = hybrid_a_star(weights, heuristic, source, target, detach=True)
    jax.block_until_ready((paths, exp_nodes))

    # Light sanity checks: the path contains both endpoints; the goal was expanded.
    assert paths.shape == (B, C, H, W) and exp_nodes.shape == (B, C, H, W)
    assert float(jnp.min(jnp.sum(paths * source, axis=(1, 2, 3)))) > 0.5
    assert float(jnp.min(jnp.sum(paths * target, axis=(1, 2, 3)))) > 0.5
    assert float(jnp.min(jnp.sum(exp_nodes * target, axis=(1, 2, 3)))) > 0.5

    print("KERNEL_OK")
</pallas_src>

<mosaic_0001>
module attributes {stable_mosaic.version = 11 : i64} {
  func.func @_hybrid_astar_kernel(%arg0: i32, %arg1: memref<1x1x256xf32, #tpu.memory_space<vmem>>, %arg2: memref<1x1x256xf32, #tpu.memory_space<vmem>>, %arg3: memref<1x1x256xf32, #tpu.memory_space<vmem>>, %arg4: memref<1x1x256xf32, #tpu.memory_space<vmem>>, %arg5: memref<1x1x256xf32, #tpu.memory_space<vmem>>, %arg6: memref<1x1x256xf32, #tpu.memory_space<vmem>>) attributes {dimension_semantics = [#tpu.dimension_semantics<parallel>], iteration_bounds = array<i64: 2>, scalar_prefetch = 0 : i64, scratch_operands = 0 : i64, tpu.core_type = #tpu.core_type<tc>, window_params = [{transform_indices = @transform_0, window_bounds = array<i64: 1, 1, 256>}, {transform_indices = @transform_1, window_bounds = array<i64: 1, 1, 256>}, {transform_indices = @transform_2, window_bounds = array<i64: 1, 1, 256>}, {transform_indices = @transform_3, window_bounds = array<i64: 1, 1, 256>}, {transform_indices = @transform_4, window_bounds = array<i64: 1, 1, 256>}, {transform_indices = @transform_5, window_bounds = array<i64: 1, 1, 256>}]} {
    %c0 = arith.constant 0 : index
    %c0_0 = arith.constant 0 : index
    %c0_1 = arith.constant 0 : index
    %0 = vector.load %arg1[%c0, %c0_0, %c0_1] : memref<1x1x256xf32, #tpu.memory_space<vmem>>, vector<1x1x256xf32>
    %1 = vector.shape_cast %0 : vector<1x1x256xf32> to vector<1x256xf32>
    %c0_2 = arith.constant 0 : index
    %c0_3 = arith.constant 0 : index
    %c0_4 = arith.constant 0 : index
    %2 = vector.load %arg2[%c0_2, %c0_3, %c0_4] : memref<1x1x256xf32, #tpu.memory_space<vmem>>, vector<1x1x256xf32>
    %3 = vector.shape_cast %2 : vector<1x1x256xf32> to vector<1x256xf32>
    %c0_5 = arith.constant 0 : index
    %c0_6 = arith.constant 0 : index
    %c0_7 = arith.constant 0 : index
    %4 = vector.load %arg3[%c0_5, %c0_6, %c0_7] : memref<1x1x256xf32, #tpu.memory_space<vmem>>, vector<1x1x256xf32>
    %5 = vector.shape_cast %4 : vector<1x1x256xf32> to vector<1x256xf32>
    %c0_8 = arith.constant 0 : index
    %c0_9 = arith.constant 0 : index
    %c0_10 = arith.constant 0 : index
    %6 = vector.load %arg4[%c0_8, %c0_9, %c0_10] : memref<1x1x256xf32, #tpu.memory_space<vmem>>, vector<1x1x256xf32>
    %7 = vector.shape_cast %6 : vector<1x1x256xf32> to vector<1x256xf32>
    %8 = tpu.iota {dimensions = array<i32: 1>} : vector<1x256xi32>
    %9 = arith.sitofp %8 : vector<1x256xi32> to vector<1x256xf32>
    %cst = arith.constant 5.000000e-01 : f32
    %10 = vector.broadcast %cst : f32 to vector<1x256xf32>
    %11 = arith.addf %9, %10 : vector<1x256xf32>
    %cst_11 = arith.constant 6.250000e-02 : f32
    %12 = vector.broadcast %cst_11 : f32 to vector<1x256xf32>
    %13 = arith.mulf %11, %12 : vector<1x256xf32>
    %14 = math.floor %13 : vector<1x256xf32>
    %15 = arith.fptosi %14 : vector<1x256xf32> to vector<1x256xi32>
    %c16_i32 = arith.constant 16 : i32
    %16 = vector.broadcast %c16_i32 : i32 to vector<1x256xi32>
    %17 = arith.muli %15, %16 : vector<1x256xi32>
    %18 = arith.subi %8, %17 : vector<1x256xi32>
    %cst_12 = arith.constant 5.000000e-01 : f32
    %19 = vector.broadcast %cst_12 : f32 to vector<1x256xf32>
    %20 = arith.cmpf ogt, %5, %19 : vector<1x256xf32>
    %c1073741824_i32 = arith.constant 1073741824 : i32
    %21 = vector.broadcast %c1073741824_i32 : i32 to vector<1x256xi32>
    %22 = arith.select %20, %8, %21 : vector<1x256xi1>, vector<1x256xi32>
    %23 = vector.shape_cast %22 : vector<1x256xi32> to vector<1x1x256xi32>
    %cst_13 = arith.constant dense<2147483647> : vector<1xi32>
    %24 = vector.multi_reduction <minsi>, %23, %cst_13 [1, 2] : vector<1x1x256xi32> to vector<1xi32>
    %25 = vector.shape_cast %24 : vector<1xi32> to vector<1x1x1xi32>
    %26 = vector.extract %25[0, 0, 0] : i32 from vector<1x1x1xi32>
    %cst_14 = arith.constant 5.000000e-01 : f32
    %27 = vector.broadcast %cst_14 : f32 to vector<1x256xf32>
    %28 = arith.cmpf ogt, %7, %27 : vector<1x256xf32>
    %c1073741824_i32_15 = arith.constant 1073741824 : i32
    %29 = vector.broadcast %c1073741824_i32_15 : i32 to vector<1x256xi32>
    %30 = arith.select %28, %8, %29 : vector<1x256xi1>, vector<1x256xi32>
    %31 = vector.shape_cast %30 : vector<1x256xi32> to vector<1x1x256xi32>
    %cst_16 = arith.constant dense<2147483647> : vector<1xi32>
    %32 = vector.multi_reduction <minsi>, %31, %cst_16 [1, 2] : vector<1x1x256xi32> to vector<1xi32>
    %33 = vector.shape_cast %32 : vector<1xi32> to vector<1x1x1xi32>
    %34 = vector.extract %33[0, 0, 0] : i32 from vector<1x1x1xi32>
    %35 = tpu.iota {dimensions = array<i32: 0>} : vector<2x256xi32>
    %c0_i32 = arith.constant 0 : i32
    %36 = vector.broadcast %c0_i32 : i32 to vector<2x256xi32>
    %37 = arith.cmpi sgt, %35, %36 : vector<2x256xi32>
    %38 = vector.shape_cast %1 : vector<1x256xf32> to vector<1x256xf32>
    %39 = vector.broadcast %38 : vector<1x256xf32> to vector<2x256xf32>
    %cst_17 = arith.constant 0.000000e+00 : f32
    %40 = vector.shape_cast %3 : vector<1x256xf32> to vector<1x256xf32>
    %41 = vector.broadcast %40 : vector<1x256xf32> to vector<2x256xf32>
    %42 = vector.broadcast %cst_17 : f32 to vector<2x256xf32>
    %43 = arith.select %37, %41, %42 : vector<2x256xi1>, vector<2x256xf32>
    %cst_18 = arith.constant 5.000000e-01 : f32
    %44 = vector.broadcast %cst_18 : f32 to vector<1x256xf32>
    %45 = arith.cmpf ogt, %5, %44 : vector<1x256xf32>
    %cst_19 = arith.constant 0.000000e+00 : f32
    %46 = vector.broadcast %cst_19 : f32 to vector<1x256xf32>
    %cst_20 = arith.constant 1.000000e+09 : f32
    %47 = vector.broadcast %cst_20 : f32 to vector<1x256xf32>
    %48 = arith.select %45, %46, %47 : vector<1x256xi1>, vector<1x256xf32>
    %49 = vector.shape_cast %48 : vector<1x256xf32> to vector<1x256xf32>
    %50 = vector.broadcast %49 : vector<1x256xf32> to vector<2x256xf32>
    %51 = vector.shape_cast %5 : vector<1x256xf32> to vector<1x256xf32>
    %52 = vector.broadcast %51 : vector<1x256xf32> to vector<2x256xf32>
    %cst_21 = arith.constant 0.000000e+00 : f32
    %53 = vector.broadcast %cst_21 : f32 to vector<2x256xf32>
    %cst_22 = arith.constant 0.000000e+00 : f32
    %54 = vector.broadcast %cst_22 : f32 to vector<2x1xf32>
    %55 = vector.shape_cast %54 : vector<2x1xf32> to vector<1x2x1xf32>
    %cst_23 = arith.constant dense<0x7F800000> : vector<1xf32>
    %56 = vector.multi_reduction <minimumf>, %55, %cst_23 [1, 2] : vector<1x2x1xf32> to vector<1xf32>
    %57 = vector.shape_cast %56 : vector<1xf32> to vector<1x1x1xf32>
    %58 = vector.extract %57[0, 0, 0] : f32 from vector<1x1x1xf32>
    %c0_i32_24 = arith.constant 0 : i32
    %59 = arith.muli %34, %c0_i32_24 : i32
    %60:6 = scf.while (%arg7 = %50, %arg8 = %52, %arg9 = %53, %arg10 = %54, %arg11 = %58, %arg12 = %59) : (vector<2x256xf32>, vector<2x256xf32>, vector<2x256xf32>, vector<2x1xf32>, f32, i32) -> (vector<2x256xf32>, vector<2x256xf32>, vector<2x256xf32>, vector<2x1xf32>, f32, i32) {
      %c257_i32 = arith.constant 257 : i32
      %73 = arith.cmpi slt, %arg12, %c257_i32 : i32
      %cst_32 = arith.constant 5.000000e-01 : f32
      %74 = arith.cmpf olt, %arg11, %cst_32 : f32
      %75 = arith.andi %73, %74 : i1
      scf.condition(%75) %arg7, %arg8, %arg9, %arg10, %arg11, %arg12 : vector<2x256xf32>, vector<2x256xf32>, vector<2x256xf32>, vector<2x1xf32>, f32, i32
    } do {
    ^bb0(%arg7: vector<2x256xf32>, %arg8: vector<2x256xf32>, %arg9: vector<2x256xf32>, %arg10: vector<2x1xf32>, %arg11: f32, %arg12: i32):
      %cst_32 = arith.constant 5.000000e-01 : f32
      %73 = vector.broadcast %cst_32 : f32 to vector<2x256xf32>
      %74 = arith.cmpf ogt, %arg8, %73 : vector<2x256xf32>
      %75 = arith.addf %arg7, %43 : vector<2x256xf32>
      %cst_33 = arith.constant 1.000000e+09 : f32
      %76 = vector.broadcast %cst_33 : f32 to vector<2x256xf32>
      %77 = arith.select %74, %75, %76 : vector<2x256xi1>, vector<2x256xf32>
      %cst_34 = arith.constant dense<0x7F800000> : vector<2xf32>
      %78 = vector.multi_reduction <minimumf>, %77, %cst_34 [1] : vector<2x256xf32> to vector<2xf32>
      %79 = vector.shape_cast %78 : vector<2xf32> to vector<2x1xf32>
      %cst_35 = arith.constant 1.000000e+08 : f32
      %80 = vector.broadcast %cst_35 : f32 to vector<2x1xf32>
      %81 = arith.cmpf olt, %79, %80 : vector<2x1xf32>
      %82 = vector.broadcast %79 : vector<2x1xf32> to vector<2x256xf32>
      %83 = arith.cmpf ole, %77, %82 : vector<2x256xf32>
      %c1073741824_i32_36 = arith.constant 1073741824 : i32
      %84 = vector.shape_cast %8 : vector<1x256xi32> to vector<1x256xi32>
      %85 = vector.broadcast %84 : vector<1x256xi32> to vector<2x256xi32>
      %86 = vector.broadcast %c1073741824_i32_36 : i32 to vector<2x256xi32>
      %87 = arith.select %83, %85, %86 : vector<2x256xi1>, vector<2x256xi32>
      %cst_37 = arith.constant dense<2147483647> : vector<2xi32>
      %88 = vector.multi_reduction <minsi>, %87, %cst_37 [1] : vector<2x256xi32> to vector<2xi32>
      %89 = vector.shape_cast %88 : vector<2xi32> to vector<2x1xi32>
      %90 = vector.broadcast %8 : vector<1x256xi32> to vector<2x256xi32>
      %91 = vector.broadcast %89 : vector<2x1xi32> to vector<2x256xi32>
      %92 = arith.cmpi eq, %90, %91 : vector<2x256xi32>
      %93 = vector.broadcast %34 : i32 to vector<2x1xi32>
      %94 = arith.cmpi eq, %89, %93 : vector<2x1xi32>
      %cst_38 = arith.constant 5.000000e-01 : f32
      %95 = vector.broadcast %cst_38 : f32 to vector<2x1xf32>
      %96 = arith.cmpf olt, %arg10, %95 : vector<2x1xf32>
      %97 = arith.andi %96, %81 : vector<2x1xi1>
      %cst_39 = arith.constant 0.000000e+00 : f32
      %98 = vector.broadcast %cst_39 : f32 to vector<2x256xf32>
      %99 = arith.select %92, %arg7, %98 : vector<2x256xi1>, vector<2x256xf32>
      %cst_40 = arith.constant dense<0.000000e+00> : vector<2xf32>
      %100 = vector.multi_reduction <add>, %99, %cst_40 [1] : vector<2x256xf32> to vector<2xf32>
      %101 = vector.shape_cast %100 : vector<2xf32> to vector<2x1xf32>
      %102 = arith.sitofp %89 : vector<2x1xi32> to vector<2x1xf32>
      %cst_41 = arith.constant 5.000000e-01 : f32
      %103 = vector.broadcast %cst_41 : f32 to vector<2x1xf32>
      %104 = arith.addf %102, %103 : vector<2x1xf32>
      %cst_42 = arith.constant 6.250000e-02 : f32
      %105 = vector.broadcast %cst_42 : f32 to vector<2x1xf32>
      %106 = arith.mulf %104, %105 : vector<2x1xf32>
      %107 = math.floor %106 : vector<2x1xf32>
      %108 = arith.fptosi %107 : vector<2x1xf32> to vector<2x1xi32>
      %c16_i32_43 = arith.constant 16 : i32
      %109 = vector.broadcast %c16_i32_43 : i32 to vector<2x1xi32>
      %110 = arith.muli %108, %109 : vector<2x1xi32>
      %111 = arith.subi %89, %110 : vector<2x1xi32>
      %112 = vector.broadcast %15 : vector<1x256xi32> to vector<2x256xi32>
      %113 = vector.broadcast %108 : vector<2x1xi32> to vector<2x256xi32>
      %114 = arith.subi %112, %113 : vector<2x256xi32>
      %115 = math.absi %114 : vector<2x256xi32>
      %c1_i32 = arith.constant 1 : i32
      %116 = vector.broadcast %c1_i32 : i32 to vector<2x256xi32>
      %117 = arith.cmpi sle, %115, %116 : vector<2x256xi32>
      %118 = vector.broadcast %18 : vector<1x256xi32> to vector<2x256xi32>
      %119 = vector.broadcast %111 : vector<2x1xi32> to vector<2x256xi32>
      %120 = arith.subi %118, %119 : vector<2x256xi32>
      %121 = math.absi %120 : vector<2x256xi32>
      %c1_i32_44 = arith.constant 1 : i32
      %122 = vector.broadcast %c1_i32_44 : i32 to vector<2x256xi32>
      %123 = arith.cmpi sle, %121, %122 : vector<2x256xi32>
      %124 = arith.andi %117, %123 : vector<2x256xi1>
      %125 = vector.broadcast %101 : vector<2x1xf32> to vector<2x256xf32>
      %126 = arith.addf %125, %39 : vector<2x256xf32>
      %127 = vector.broadcast %97 : vector<2x1xi1> to vector<2x256xi1>
      %128 = arith.andi %92, %127 : vector<2x256xi1>
      %cst_45 = arith.constant dense<true> : vector<2x256xi1>
      %129 = arith.xori %92, %cst_45 : vector<2x256xi1>
      %130 = arith.andi %124, %129 : vector<2x256xi1>
      %cst_46 = arith.constant 5.000000e-01 : f32
      %131 = vector.broadcast %cst_46 : f32 to vector<2x256xf32>
      %132 = arith.cmpf olt, %arg9, %131 : vector<2x256xf32>
      %133 = arith.andi %130, %132 : vector<2x256xi1>
      %134 = arith.cmpf olt, %126, %arg7 : vector<2x256xf32>
      %135 = arith.andi %133, %134 : vector<2x256xi1>
      %136 = vector.broadcast %97 : vector<2x1xi1> to vector<2x256xi1>
      %137 = arith.andi %135, %136 : vector<2x256xi1>
      %138 = arith.select %137, %126, %arg7 : vector<2x256xi1>, vector<2x256xf32>
      %cst_47 = arith.constant 1.000000e+00 : f32
      %139 = vector.broadcast %cst_47 : f32 to vector<2x256xf32>
      %cst_48 = arith.constant 0.000000e+00 : f32
      %140 = vector.broadcast %cst_48 : f32 to vector<2x256xf32>
      %141 = arith.select %128, %140, %arg8 : vector<2x256xi1>, vector<2x256xf32>
      %142 = arith.select %137, %139, %141 : vector<2x256xi1>, vector<2x256xf32>
      %cst_49 = arith.constant 1.000000e+00 : f32
      %143 = vector.broadcast %cst_49 : f32 to vector<2x256xf32>
      %144 = arith.select %128, %143, %arg9 : vector<2x256xi1>, vector<2x256xf32>
      %145 = arith.andi %97, %94 : vector<2x1xi1>
      %cst_50 = arith.constant dense<true> : vector<2x1xi1>
      %146 = arith.xori %81, %cst_50 : vector<2x1xi1>
      %147 = arith.ori %145, %146 : vector<2x1xi1>
      %148 = arith.extui %147 : vector<2x1xi1> to vector<2x1xi32>
      %149 = arith.sitofp %148 : vector<2x1xi32> to vector<2x1xf32>
      %150 = arith.maximumf %arg10, %149 : vector<2x1xf32>
      %151 = vector.shape_cast %150 : vector<2x1xf32> to vector<1x2x1xf32>
      %cst_51 = arith.constant dense<0x7F800000> : vector<1xf32>
      %152 = vector.multi_reduction <minimumf>, %151, %cst_51 [1, 2] : vector<1x2x1xf32> to vector<1xf32>
      %153 = vector.shape_cast %152 : vector<1xf32> to vector<1x1x1xf32>
      %154 = vector.extract %153[0, 0, 0] : f32 from vector<1x1x1xf32>
      %c1_i32_52 = arith.constant 1 : i32
      %155 = arith.addi %arg12, %c1_i32_52 : i32
      scf.yield %138, %142, %144, %150, %154, %155 : vector<2x256xf32>, vector<2x256xf32>, vector<2x256xf32>, vector<2x1xf32>, f32, i32
    }
    %61 = vector.extract_strided_slice %60#0 {offsets = [0, 0], sizes = [1, 256], strides = [1, 1]} : vector<2x256xf32> to vector<1x256xf32>
    %62 = vector.extract_strided_slice %60#2 {offsets = [1, 0], sizes = [1, 256], strides = [1, 1]} : vector<2x256xf32> to vector<1x256xf32>
    %c0_i32_25 = arith.constant 0 : i32
    %63 = arith.cmpi slt, %34, %c0_i32_25 : i32
    %64 = arith.extui %63 : i1 to i32
    %65 = arith.sitofp %64 : i32 to f32
    %66:4 = scf.while (%arg7 = %34, %arg8 = %7, %arg9 = %65, %arg10 = %59) : (i32, vector<1x256xf32>, f32, i32) -> (i32, vector<1x256xf32>, f32, i32) {
      %c257_i32 = arith.constant 257 : i32
      %73 = arith.cmpi slt, %arg10, %c257_i32 : i32
      %cst_32 = arith.constant 5.000000e-01 : f32
      %74 = arith.cmpf olt, %arg9, %cst_32 : f32
      %75 = arith.andi %73, %74 : i1
      scf.condition(%75) %arg7, %arg8, %arg9, %arg10 : i32, vector<1x256xf32>, f32, i32
    } do {
    ^bb0(%arg7: i32, %arg8: vector<1x256xf32>, %arg9: f32, %arg10: i32):
      %73 = arith.cmpi eq, %arg7, %26 : i32
      %74 = arith.extui %73 : i1 to i32
      %75 = arith.sitofp %74 : i32 to f32
      %76 = arith.maximumf %arg9, %75 : f32
      %cst_32 = arith.constant 5.000000e-01 : f32
      %77 = arith.cmpf olt, %76, %cst_32 : f32
      %78 = arith.sitofp %arg7 : i32 to f32
      %cst_33 = arith.constant 5.000000e-01 : f32
      %79 = arith.addf %78, %cst_33 : f32
      %cst_34 = arith.constant 6.250000e-02 : f32
      %80 = arith.mulf %79, %cst_34 : f32
      %81 = math.floor %80 : f32
      %82 = arith.fptosi %81 : f32 to i32
      %c16_i32_35 = arith.constant 16 : i32
      %83 = arith.muli %82, %c16_i32_35 : i32
      %84 = arith.subi %arg7, %83 : i32
      %85 = vector.broadcast %82 : i32 to vector<1x256xi32>
      %86 = arith.subi %15, %85 : vector<1x256xi32>
      %87 = math.absi %86 : vector<1x256xi32>
      %c1_i32 = arith.constant 1 : i32
      %88 = vector.broadcast %c1_i32 : i32 to vector<1x256xi32>
      %89 = arith.cmpi sle, %87, %88 : vector<1x256xi32>
      %90 = vector.broadcast %84 : i32 to vector<1x256xi32>
      %91 = arith.subi %18, %90 : vector<1x256xi32>
      %92 = math.absi %91 : vector<1x256xi32>
      %c1_i32_36 = arith.constant 1 : i32
      %93 = vector.broadcast %c1_i32_36 : i32 to vector<1x256xi32>
      %94 = arith.cmpi sle, %92, %93 : vector<1x256xi32>
      %95 = arith.andi %89, %94 : vector<1x256xi1>
      %96 = vector.broadcast %arg7 : i32 to vector<1x256xi32>
      %97 = arith.cmpi ne, %8, %96 : vector<1x256xi32>
      %98 = arith.andi %95, %97 : vector<1x256xi1>
      %cst_37 = arith.constant 1.000000e+09 : f32
      %99 = vector.broadcast %cst_37 : f32 to vector<1x256xf32>
      %100 = arith.select %98, %61, %99 : vector<1x256xi1>, vector<1x256xf32>
      %101 = vector.shape_cast %100 : vector<1x256xf32> to vector<1x1x256xf32>
      %cst_38 = arith.constant dense<0x7F800000> : vector<1xf32>
      %102 = vector.multi_reduction <minimumf>, %101, %cst_38 [1, 2] : vector<1x1x256xf32> to vector<1xf32>
      %103 = vector.shape_cast %102 : vector<1xf32> to vector<1x1x1xf32>
      %104 = vector.extract %103[0, 0, 0] : f32 from vector<1x1x1xf32>
      %cst_39 = arith.constant 1.000000e+08 : f32
      %105 = arith.cmpf oge, %104, %cst_39 : f32
      %106 = vector.broadcast %104 : f32 to vector<1x256xf32>
      %107 = arith.cmpf ole, %100, %106 : vector<1x256xf32>
      %c1073741824_i32_40 = arith.constant 1073741824 : i32
      %108 = vector.broadcast %c1073741824_i32_40 : i32 to vector<1x256xi32>
      %109 = arith.select %107, %8, %108 : vector<1x256xi1>, vector<1x256xi32>
      %110 = vector.shape_cast %109 : vector<1x256xi32> to vector<1x1x256xi32>
      %cst_41 = arith.constant dense<2147483647> : vector<1xi32>
      %111 = vector.multi_reduction <minsi>, %110, %cst_41 [1, 2] : vector<1x1x256xi32> to vector<1xi32>
      %112 = vector.shape_cast %111 : vector<1xi32> to vector<1x1x1xi32>
      %113 = vector.extract %112[0, 0, 0] : i32 from vector<1x1x1xi32>
      %true = arith.constant true
      %114 = arith.xori %105, %true : i1
      %115 = arith.andi %77, %114 : i1
      %116 = vector.broadcast %113 : i32 to vector<1x256xi32>
      %117 = arith.cmpi eq, %8, %116 : vector<1x256xi32>
      %118 = vector.broadcast %115 : i1 to vector<1x256xi1>
      %119 = arith.andi %118, %117 : vector<1x256xi1>
      %cst_42 = arith.constant 1.000000e+00 : f32
      %120 = vector.broadcast %cst_42 : f32 to vector<1x256xf32>
      %121 = arith.select %119, %120, %arg8 : vector<1x256xi1>, vector<1x256xf32>
      %122 = arith.select %115, %113, %arg7 : i32
      %123 = arith.andi %77, %105 : i1
      %124 = arith.extui %123 : i1 to i32
      %125 = arith.sitofp %124 : i32 to f32
      %126 = arith.maximumf %76, %125 : f32
      %c1_i32_43 = arith.constant 1 : i32
      %127 = arith.addi %arg10, %c1_i32_43 : i32
      scf.yield %122, %121, %126, %127 : i32, vector<1x256xf32>, f32, i32
    }
    %c0_26 = arith.constant 0 : index
    %c0_27 = arith.constant 0 : index
    %c0_28 = arith.constant 0 : index
    %67 = vector.load %arg5[%c0_26, %c0_27, %c0_28] : memref<1x1x256xf32, #tpu.memory_space<vmem>>, vector<1x1x256xf32>
    %68 = vector.shape_cast %67 : vector<1x1x256xf32> to vector<1x256xf32>
    %69 = vector.shape_cast %66#1 : vector<1x256xf32> to vector<1x1x256xf32>
    tpu.vector_store %arg5[%c0_26, %c0_27, %c0_28], %69 {strides = array<i32>} : memref<1x1x256xf32, #tpu.memory_space<vmem>>, vector<1x1x256xf32>,
    %c0_29 = arith.constant 0 : index
    %c0_30 = arith.constant 0 : index
    %c0_31 = arith.constant 0 : index
    %70 = vector.load %arg6[%c0_29, %c0_30, %c0_31] : memref<1x1x256xf32, #tpu.memory_space<vmem>>, vector<1x1x256xf32>
    %71 = vector.shape_cast %70 : vector<1x1x256xf32> to vector<1x256xf32>
    %72 = vector.shape_cast %62 : vector<1x256xf32> to vector<1x1x256xf32>
    tpu.vector_store %arg6[%c0_29, %c0_30, %c0_31], %72 {strides = array<i32>} : memref<1x1x256xf32, #tpu.memory_space<vmem>>, vector<1x1x256xf32>,
    return
  }
  func.func @transform_0(%arg0: i32) -> (i32, i32, i32) {
    %c0_i32 = arith.constant 0 : i32
    %c0_i32_0 = arith.constant 0 : i32
    %c0_i32_1 = arith.constant 0 : i32
    return %arg0, %c0_i32, %c0_i32_0 : i32, i32, i32
  }
  func.func @transform_1(%arg0: i32) -> (i32, i32, i32) {
    %c0_i32 = arith.constant 0 : i32
    %c0_i32_0 = arith.constant 0 : i32
    %c0_i32_1 = arith.constant 0 : i32
    return %arg0, %c0_i32, %c0_i32_0 : i32, i32, i32
  }
  func.func @transform_2(%arg0: i32) -> (i32, i32, i32) {
    %c0_i32 = arith.constant 0 : i32
    %c0_i32_0 = arith.constant 0 : i32
    %c0_i32_1 = arith.constant 0 : i32
    return %arg0, %c0_i32, %c0_i32_0 : i32, i32, i32
  }
  func.func @transform_3(%arg0: i32) -> (i32, i32, i32) {
    %c0_i32 = arith.constant 0 : i32
    %c0_i32_0 = arith.constant 0 : i32
    %c0_i32_1 = arith.constant 0 : i32
    return %arg0, %c0_i32, %c0_i32_0 : i32, i32, i32
  }
  func.func @transform_4(%arg0: i32) -> (i32, i32, i32) {
    %c0_i32 = arith.constant 0 : i32
    %c0_i32_0 = arith.constant 0 : i32
    %c0_i32_1 = arith.constant 0 : i32
    return %arg0, %c0_i32, %c0_i32_0 : i32, i32, i32
  }
  func.func @transform_5(%arg0: i32) -> (i32, i32, i32) {
    %c0_i32 = arith.constant 0 : i32
    %c0_i32_0 = arith.constant 0 : i32
    %c0_i32_1 = arith.constant 0 : i32
    return %arg0, %c0_i32, %c0_i32_0 : i32, i32, i32
  }
}

</mosaic_0001>

<bundles_post_ra>
// kernel: hybrid_a_star.1
= control target key start
LH: loop header
LB: loop body
LE: loop exit
PB: predicated region body
PF: predicated region fallthrough
CT: control target
= control target key end

     0   :  { %s1176_s18 = smov 0   ;;  %s1570_s0 = inlined_call_operand.vmem [shape: f32[2,1,256], index: 0, kind: input, shape index: {}]   ;;  %s1571_s1 = inlined_call_operand.vmem [shape: f32[2,1,256], index: 1, kind: input, shape index: {}]   ;;  %s1572_s2 = inlined_call_operand.vmem [shape: f32[2,1,256], index: 2, kind: input, shape index: {}]   ;;  %s1573_s3 = inlined_call_operand.vmem [shape: f32[2,1,256], index: 3, kind: input, shape index: {}]   ;;  %s1574_s4 = inlined_call_operand.vmem [shape: f32[2,1,256], index: 4, kind: output, shape index: {0}]   ;;  %s1575_s5 = inlined_call_operand.vmem [shape: f32[2,1,256], index: 5, kind: output, shape index: {1}]  }
   0x1 LB: > { %s847_s19 = sadd.s32 4294967295, %s1081_s18   ;;  %p851_p0 = scmp.ge.s32.totalorder %s1081_s18, 1  ;;  %s1081_s18 = sphi %s1176_s18, %s16_s18  }
   0x2   : > { %p216_p1 = scmp.lt.s32.totalorder %s1081_s18, 3 }
   0x4   : > { %p217_p2 = pnand %p851_p0, %p216_p1 }
   0x5   : > { %p258_p3 = scmp.lt.s32.totalorder (!%p217_p2), %s847_s19, 1  ;;  %s1264_s16 = smov (!%p217_p2), 0  }
   0x6   : > { %220 = sbr.rel (%p217_p2) target bundleno = 1380 (0x564), region = 36 }
   0xb   : > { %v286_v0 = vlaneseq  ;;  %s1610_s19 = smov (!%p258_p3, %s847_s19), 1  ;;  %vm1576_vm0 = vcmask 1040384   ;;  %v1143_v15 = vmov 1e+09  }
   0xc   : > { %s1188_s20 = sshll.u32 %s1610_s19, 1 }
   0xd   : > { %v1185_v1 = vand.u32 127, %v286_v0  ;;  %v371_v2 = vshrl.u32 %v286_v0, 7  ;;  %s269_s23 = scalar_lea.vmem %s1572_s2, %s1188_s20  ;;  %s277_s26 = scalar_lea.vmem %s1574_s4, %s1188_s20 }
   0xe   : > { %s281_s29 = scalar_lea.vmem %s1575_s5, %s1188_s20  ;;  %v1206_v5 = vld [vmem:[%s269_s23] sm:$0x3]  ;;  %s261_s7 = scalar_lea.vmem %s1570_s0, %s1188_s20 }
   0xf   : > { %v1191_v3 = vadd.s32 128, %v1185_v1  ;;  %v289_v4 = vcvt.s32.f32 %v1185_v1  ;;  %vm303_vm1 = vcmp.gt.f32.partialorder %v1206_v5, 0.5  ;;  %vm372_vm2 = vcmp.gt.s32.totalorder %v371_v2, 0  ;;  %s265_s10 = scalar_lea.vmem %s1571_s1, %s1188_s20  ;;  %v1221_v11 = vld [vmem:[%s261_s7] sm:$0x3]  ;;  %s273_s13 = scalar_lea.vmem %s1573_s3, %s1188_s20 }
  0x10   : > { %v392_v9 = vperm.slane %v1206_v5, 0   ;;  %v393_v10 = vperm.slane %v1206_v5, 1   ;;  %v1229_v16 = vsel %vm303_vm1, 0.0, %v1143_v15  ;;  %v283_v17 = vld [vmem:[%s265_s10] sm:$0x3]  ;;  %v374_v21 = vperm.slane %v1221_v11, 0 }
  0x11   : > { %v290_v6 = vcvt.s32.f32 %v1191_v3  ;;  %v291_v7 = vadd.f32 0.5, %v289_v4  ;;  %v304_v8 = vrot.slane %v1191_v3, 7  ;;  %v387_v19 = vperm.slane %v1229_v16, 0   ;;  %v1234_v22 = vld [vmem:[%s273_s13] sm:$0x3] }
  0x12   : > { %v388_v20 = vperm.slane %v1229_v16, 1   ;;  %v375_v27 = vperm.slane %v1221_v11, 1  ;;  %v379_v28 = vperm.slane %v283_v17, 0  ;;  %v380_v29 = vperm.slane %v283_v17, 1 }
  0x13   : > { %v292_v12 = vadd.f32 0.5, %v290_v6  ;;  %v293_v13 = vmul.f32 0.0625, %v291_v7  ;;  %v306_v14 = vsel %vm1576_vm0, %v1185_v1, %v304_v8  ;;  %vm338_vm3 = vcmp.gt.f32.partialorder %v1234_v22, 0.5 }
  0x14   : > { %v307_v18 = vsel %vm303_vm1, %v306_v14, 1073741824  ;;  %v1243_v34 = vsel %vm372_vm2, %v379_v28, 0.0  ;;  %v1246_v35 = vsel %vm372_vm2, %v380_v29, 0.0  ;;  %v339_v36 = vsel %vm338_vm3, %v306_v14, 1073741824 }
  0x15   : > { %v294_v23 = vmul.f32 0.0625, %v292_v12  ;;  %v295_v24 = vfloor.f32 %v293_v13  ;;  %v308_v25 = vperm.slane %v307_v18, 0  ;;  %v309_v26 = vperm.slane %v307_v18, 1 }
  0x16   : > { %v340_v40 = vperm.slane %v339_v36, 0  ;;  %v341_v42 = vperm.slane %v339_v36, 1  ;;  %v1270_v36 = vmov 0.0  }
  0x17   : > { %v296_v30 = vfloor.f32 %v294_v23  ;;  %v1238_v31 = vcvt.f32.s32 %v295_v24  ;;  %v310_v32 = vsel %vm1576_vm0, %v308_v25, 2147483647  ;;  %v311_v33 = vsel %vm1576_vm0, %v309_v26, 2147483647 }
  0x18   : > { %vm312_vm4 = vcmp.lt.s32.totalorder %v310_v32, %v311_v33  ;;  %v342_v45 = vsel %vm1576_vm0, %v340_v40, 2147483647  ;;  %v343_v47 = vsel %vm1576_vm0, %v341_v42, 2147483647 }
  0x19   : > { %v1248_v37 = vcvt.f32.s32 %v296_v30  ;;  %v299_v38 = vmul.u32 16, %v1238_v31  ;;  %v313_v39 = vsel %vm312_vm4, %v310_v32, %v311_v33  ;;  %vm344_vm5 = vcmp.lt.s32.totalorder %v342_v45, %v343_v47 }
  0x1a   : > { %v315_v41 = vshra.s32 %v313_v39, 16  ;;  %v345_v49 = vsel %vm344_vm5, %v342_v45, %v343_v47  ;;  %v314_v52 = vand.u32 65535, %v313_v39  ;;  %v1266_v32 = vmov 0.0  }
  0x1b   : > { %v300_v43 = vmul.u32 16, %v1248_v37  ;;  %v1253_v44 = vsub.s32 %v1185_v1, %v299_v38  ;;  %v347_v50 = vshra.s32 %v345_v49, 16  ;;  %v346_v56 = vand.u32 65535, %v345_v49 }
  0x1c   : > { %v317_v46 = vcvt.s32.f32 %v315_v41  ;;  %v316_v53 = vcvt.s32.f32 %v314_v52  ;;  %v1268_v33 = vmov 0.0  }
  0x1d   : > { %v1258_v48 = vsub.s32 %v1191_v3, %v300_v43  ;;  %v349_v51 = vcvt.s32.f32 %v347_v50  ;;  %v348_v57 = vcvt.s32.f32 %v346_v56 }
  0x1e   : > { %318 = vmin.xlane.f32.xlu0 %v317_v46 }
  0x26   : > { %350 = vmin.xlane.f32.xlu0 %v349_v51 }
  0x91   : > { %v319_v54 = vpop.xlane.xlu0 %318 }
  0x92   : > { %vm320_vm6 = vcmp.eq.f32.partialorder %v317_v46, %v319_v54  ;;  %v325_v60 = vcvt.f32.s32 %v319_v54 }
  0x93   : > { %v321_v55 = vsel %vm320_vm6, %v316_v53, inf }
  0x94   : > { %322 = vmin.xlane.f32.xlu1 %v321_v55  ;;  %v326_v62 = vshll.u32 %v325_v60, 16 }
  0x99   : > { %v351_v58 = vpop.xlane.xlu0 %350 }
  0x9a   : > { %vm352_vm7 = vcmp.eq.f32.partialorder %v349_v51, %v351_v58  ;;  %v357_v4 = vcvt.f32.s32 %v351_v58 }
  0x9b   : > { %v353_v59 = vsel %vm352_vm7, %v348_v57, inf }
  0x9c   : > { %354 = vmin.xlane.f32.xlu1 %v353_v59  ;;  %v358_v12 = vshll.u32 %v357_v4, 16 }
 0x107   : > { %v323_v61 = vpop.xlane.xlu1 %322 }
 0x108   : > { %v324_v63 = vcvt.f32.s32 %v323_v61 }
 0x10a   : > { %v327_v2 = vadd.s32 %v326_v62, %v324_v63 }
 0x10c   : > { %v328_v6 = vrot.slane %v327_v2, 4 }
 0x10e   : > { %vm329_vm8 = vcmp.lt.s32.totalorder %v327_v2, %v328_v6 }
 0x10f   : > { %v355_v7 = vpop.xlane.xlu1 %354  ;;  %v330_v8 = vsel %vm329_vm8, %v327_v2, %v328_v6 }
 0x110   : > { %v356_v13 = vcvt.f32.s32 %v355_v7  ;;  %v331_v14 = vrot.slane %v330_v8, 2 }
 0x112   : > { %v359_v15 = vadd.s32 %v358_v12, %v356_v13  ;;  %vm332_vm9 = vcmp.lt.s32.totalorder %v330_v8, %v331_v14 }
 0x113   : > { %v333_v17 = vsel %vm332_vm9, %v330_v8, %v331_v14 }
 0x114   : > { %v360_v18 = vrot.slane %v359_v15, 4  ;;  %v334_v23 = vrot.slane %v333_v17, 1 }
 0x116   : > { %vm361_vm10 = vcmp.lt.s32.totalorder %v359_v15, %v360_v18  ;;  %vm335_vm11 = vcmp.lt.s32.totalorder %v333_v17, %v334_v23 }
 0x117   : > { %v336_v24 = vsel %vm335_vm11, %v333_v17, %v334_v23  ;;  %v362_v25 = vsel %vm361_vm10, %v359_v15, %v360_v18 }
 0x118   : > { %870 = vpush %v336_v24  ;;  %v363_v26 = vrot.slane %v362_v25, 2 }
 0x11a   : > { %vm364_vm12 = vcmp.lt.s32.totalorder %v362_v25, %v363_v26 }
 0x11b   : > { %v365_v28 = vsel %vm364_vm12, %v362_v25, %v363_v26 }
 0x11c   : > { %v366_v29 = vrot.slane %v365_v28, 1 }
 0x11e   : > { %vm367_vm13 = vcmp.lt.s32.totalorder %v365_v28, %v366_v29 }
 0x11f   : > { %v368_v30 = vsel %vm367_vm13, %v365_v28, %v366_v29 }
 0x120   : > { %872 = vpush %v368_v30 }
 0x149   : > { %s1260_s14 = spop %870 }
 0x151   : > { %s1262_s15 = spop %872  }
 0x152 LB: >> { %vm412_vm14 = vcmp.gt.f32.partialorder %v1105_v9, 0.5  ;;  %vm413_vm15 = vcmp.gt.f32.partialorder %v1101_v10, 0.5  ;;  %v414_v5 = vadd.f32 %v1113_v19, %v1243_v34  ;;  %v415_v16 = vadd.f32 %v1109_v20, %v1246_v35  ;;  %s531_s17 = sadd.s32 1, %s1085_s16   ;;  %v1113_v19 = vphi %v387_v19, %v1595_v19   ;;  %v1109_v20 = vphi %v388_v20, %v1594_v20   ;;  %v1105_v9 = vphi %v392_v9, %v513_v9   ;;  %v1101_v10 = vphi %v393_v10, %v514_v10   ;;  %v1097_v36 = vphi %v1270_v36, %v1593_v36   ;;  %v1093_v33 = vphi %v1268_v33, %v1592_v33   ;;  %v1089_v32 = vphi %v1266_v32, %v1345_v32   ;;  %s1085_s16 = sphi %s1264_s16, %s1591_s16  }
 0x153   : >> { %vm418_vm1 = vcmask 1041408   ;;  %vm451_vm7 = vcmp.lt.f32.partialorder %v1089_v32, 0.5  ;;  %v449_v61 = vstv %s1262_s15  ;;  %vm1144_vm9 = vmmov 1   ;;  %p406_p4 = scmp.lt.s32.totalorder %s531_s17, 257  ;;  %s1591_s16 = smov %s531_s17 }
 0x154   : >> { %v416_v38 = vsel %vm412_vm14, %v414_v5, 1e+09  ;;  %v417_v39 = vsel %vm413_vm15, %v415_v16, 1e+09  ;;  %v1145_v14 = vmov 0.0   ;;  %v1582_v25 = vmov 0 }
 0x155   : >> { %v419_v40 = vsel %vm418_vm1, %v416_v38, inf  ;;  %v420_v41 = vsel %vm418_vm1, %v417_v39, inf }
 0x156   : >> { %v421_v42 = vmin.f32 %v419_v40, %v420_v41 }
 0x158   : >> { %422 = vmin.xlane.f32.xlu0 %v421_v42 }
 0x1cb   : >> { %v423_v43 = vpop.xlane.xlu0 %422 }
 0x1cc   : >> { %vm425_vm2 = vcmp.le.f32.partialorder %v416_v38, %v423_v43  ;;  %vm426_vm3 = vcmp.le.f32.partialorder %v417_v39, %v423_v43  ;;  %vm424_vm6 = vcmp.lt.f32.partialorder %v423_v43, 1e+08 }
 0x1cd   : >> { %v427_v45 = vsel %vm425_vm2, %v1185_v1, 1073741824  ;;  %v428_v46 = vsel %vm426_vm3, %v1191_v3, 1073741824  ;;  %vm1326_vm8 = vmand %vm451_vm7, %vm424_vm6 }
 0x1ce   : >> { %v429_v47 = vsel %vm418_vm1, %v427_v45, 2147483647  ;;  %v430_v49 = vsel %vm418_vm1, %v428_v46, 2147483647  ;;  %vm518_vm10 = vmxor %vm424_vm6, %vm1144_vm9 }
 0x1cf   : >> { %vm431_vm4 = vcmp.lt.s32.totalorder %v429_v47, %v430_v49 }
 0x1d0   : >> { %v432_v50 = vsel %vm431_vm4, %v429_v47, %v430_v49 }
 0x1d1   : >> { %v434_v51 = vshra.s32 %v432_v50, 16  ;;  %v433_v53 = vand.u32 65535, %v432_v50 }
 0x1d3   : >> { %v436_v52 = vcvt.s32.f32 %v434_v51  ;;  %v435_v55 = vcvt.s32.f32 %v433_v53 }
 0x1d5   : >> { %437 = vmin.xlane.f32.xlu0 %v436_v52 }
 0x248   : >> { %v438_v54 = vpop.xlane.xlu0 %437 }
 0x249   : >> { %vm439_vm5 = vcmp.eq.f32.partialorder %v436_v52, %v438_v54  ;;  %v444_v57 = vcvt.f32.s32 %v438_v54 }
 0x24a   : >> { %v440_v56 = vsel %vm439_vm5, %v435_v55, inf }
 0x24b   : >> { %441 = vmin.xlane.f32.xlu1 %v440_v56  ;;  %v445_v59 = vshll.u32 %v444_v57, 16 }
 0x2be   : >> { %v442_v58 = vpop.xlane.xlu1 %441 }
 0x2bf   : >> { %v443_v60 = vcvt.f32.s32 %v442_v58 }
 0x2c1   : >> { %v446_v62 = vadd.s32 %v445_v59, %v443_v60 }
 0x2c3   : >> { %v460_v2 = vcvt.s32.f32 %v446_v62  ;;  %vm447_vm11 = vcmp.eq.s32.totalorder %v1185_v1, %v446_v62  ;;  %vm448_vm12 = vcmp.eq.s32.totalorder %v1191_v3, %v446_v62  ;;  %vm450_vm13 = vcmp.eq.s32.totalorder %v446_v62, %v449_v61 }
 0x2c4   : >> { %v453_v4 = vsel %vm447_vm11, %v1113_v19, 0.0  ;;  %v454_v6 = vsel %vm448_vm12, %v1109_v20, 0.0  ;;  %vm517_vm14 = vmand %vm1326_vm8, %vm450_vm13 }
 0x2c5   : >> { %v461_v7 = vadd.f32 0.5, %v460_v2  ;;  %v455_v8 = vsel %vm418_vm1, %v453_v4, 0.0  ;;  %v456_v12 = vsel %vm418_vm1, %v454_v6, 0.0  ;;  %vm519_vm15 = vmor %vm517_vm14, %vm518_vm10 }
 0x2c6   : >> { %v457_v13 = vadd.f32 %v456_v12, %v455_v8  ;;  %v858_v15 = vsel %vm519_vm15, 1.0, %v1145_v14  ;;  %vm1351_vm2 = vmand %vm447_vm11, %vm1326_vm8 }
 0x2c7   : >> { %v462_v17 = vmul.f32 0.0625, %v461_v7  ;;  %v1345_v32 = vmax.f32 %v1089_v32, %v858_v15   ;;  %vm1361_vm3 = vmand %vm448_vm12, %vm1326_vm8  ;;  %v1368_v26 = vsel %vm1351_vm2, 1.0, %v1097_v36  }
 0x2c8   : >> { %458 = vadd.xlane.f32.xlu1 %v457_v13  ;;  %v1583_v25 = vsel %vm1361_vm3, 4294967295, %v1582_v25  ;;  %v1373_v29 = vsel %vm1361_vm3, 1.0, %v1093_v33   ;;  %vm1382_vm7 = vmxor %vm447_vm11, %vm1144_vm9  ;;  %vm500_vm3 = vcmp.lt.f32.partialorder %v1093_v33, 0.5  ;;  %v511_v33 = vsel %vm1351_vm2, 0.0, %v1105_v9 }
 0x2c9   : >> { %v463_v23 = vfloor.f32 %v462_v17  ;;  %v523_v24 = vsel %vm418_vm1, %v1345_v32, inf  ;;  %vm1389_vm14 = vmxor %vm448_vm12, %vm1144_vm9 }
 0x2ca   : >> { %v524_v28 = vrot.slane %v523_v24, 4 }
 0x2cb   : >> { %v875_v30 = vcvt.f32.s32 %v463_v23 }
 0x2cc   : >> { %v525_v5 = vmin.f32 %v523_v24, %v524_v28 }
 0x2cd   : >> { %v465_v16 = vmul.u32 16, %v875_v30  ;;  %v467_v38 = vsub.s32 %v1238_v31, %v875_v30  ;;  %v468_v39 = vsub.s32 %v1248_v37, %v875_v30 }
 0x2ce   : >> { %v526_v40 = vrot.slane %v525_v5, 2 }
 0x2cf   : >> { %v466_v41 = vsub.s32 %v446_v62, %v465_v16  ;;  %v470_v42 = vsub.s32 0, %v467_v38  ;;  %vm469_vm1 = vcmp.lt.s32.totalorder %v467_v38, 0  ;;  %v473_v45 = vsub.s32 0, %v468_v39 }
 0x2d0   : >> { %v527_v43 = vmin.f32 %v525_v5, %v526_v40  ;;  %vm472_vm4 = vcmp.lt.s32.totalorder %v468_v39, 0 }
 0x2d1   : >> { %v477_v46 = vsub.s32 %v1253_v44, %v466_v41  ;;  %v478_v47 = vsub.s32 %v1258_v48, %v466_v41  ;;  %v471_v50 = vsel %vm469_vm1, %v470_v42, %v467_v38  ;;  %v474_v53 = vsel %vm472_vm4, %v473_v45, %v468_v39 }
 0x2d2   : >> { %v528_v49 = vrot.slane %v527_v43, 1  ;;  %vm475_vm10 = vcmp.le.s32.totalorder %v471_v50, 1  ;;  %vm476_vm15 = vcmp.le.s32.totalorder %v474_v53, 1 }
 0x2d3   : >> { %vm479_vm5 = vcmp.lt.s32.totalorder %v477_v46, 0  ;;  %v480_v51 = vsub.s32 0, %v477_v46  ;;  %vm482_vm6 = vcmp.lt.s32.totalorder %v478_v47, 0  ;;  %v483_v54 = vsub.s32 0, %v478_v47 }
 0x2d4   : >> { %v529_v52 = vmin.f32 %v527_v43, %v528_v49 }
 0x2d5   : >> { %v481_v55 = vsel %vm479_vm5, %v480_v51, %v477_v46  ;;  %v484_v57 = vsel %vm482_vm6, %v483_v54, %v478_v47  ;;  %vm499_vm6 = vcmp.lt.f32.partialorder %v1097_v36, 0.5 }
 0x2d6   : >> { %876 = vpush %v529_v52  ;;  %vm485_vm13 = vcmp.le.s32.totalorder %v481_v55, 1  ;;  %vm486_vm1 = vcmp.le.s32.totalorder %v484_v57, 1 }
 0x2d7   : >> { %vm487_vm4 = vmand %vm475_vm10, %vm485_vm13 }
 0x2d8   : >> { %vm488_vm5 = vmand %vm476_vm15, %vm486_vm1 }
 0x2d9   : >> { %vm497_vm11 = vmand %vm487_vm4, %vm1382_vm7 }
 0x2da   : >> { %vm498_vm0 = vmand %vm488_vm5, %vm1389_vm14 }
 0x2db   : >> { %vm501_vm9 = vmand %vm497_vm11, %vm499_vm6 }
 0x2dc   : >> { %vm502_vm12 = vmand %vm498_vm0, %vm500_vm3  ;;  %vm1589_vm0 = vnez %v1583_v25 }
 0x2dd   : >> { %v512_v36 = vsel %vm1589_vm0, 0.0, %v1101_v10 }
 0x307   : >> { %s877_s19 = spop %876 }
 0x308   : >> { %p407_p5 = scmp.lt.f32.partialorder %s877_s19, 0.5 }
 0x30a   : >> { %p408_p6 = pnand %p407_p5, %p406_p4 }
 0x30b   : > { %p532_p7 = scmp.lt.s32.totalorder (%p408_p6), %s1262_s15, 0  ;;  %v537_v63 = vperm.slane (%p408_p6), %v1234_v22, 1  }
 0x30d   : > { %v1596_v4 = vmov (%p408_p6), %v537_v63 }
 0x33b   : >> { %v459_v59 = vpop.xlane.xlu1 %458 }
 0x33c   : >> { %v489_v60 = vadd.f32 %v459_v59, %v374_v21  ;;  %v490_v61 = vadd.f32 %v459_v59, %v375_v27 }
 0x33e   : >> { %vm503_vm10 = vcmp.lt.f32.partialorder %v489_v60, %v1113_v19  ;;  %vm504_vm7 = vcmp.lt.f32.partialorder %v490_v61, %v1109_v20 }
 0x33f   : >> { %vm505_vm13 = vmand %vm501_vm9, %vm503_vm10 }
 0x340   : >> { %vm506_vm14 = vmand %vm502_vm12, %vm504_vm7 }
 0x341   : >> { %vm507_vm15 = vmand %vm505_vm13, %vm1326_vm8  ;;  %411 = sbr.rel (!%p408_p6) target bundleno = 338 (0x152), region = 102 }
 0x342   : >> { %vm508_vm1 = vmand %vm506_vm14, %vm1326_vm8  ;;  %v1413_v19 = vsel %vm507_vm15, %v489_v60, %v1113_v19   ;;  %v513_v9 = vsel %vm507_vm15, 1.0, %v511_v33   ;;  %v1592_v33 = vmov %v1373_v29 }
 0x343   : >> { %v1588_v62 = vmov %v1413_v19  ;;  %v1419_v20 = vsel %vm508_vm1, %v490_v61, %v1109_v20   ;;  %v514_v10 = vsel %vm508_vm1, 1.0, %v512_v36   ;;  %v1593_v36 = vmov %v1368_v26 }
 0x344   : >> { %v1590_v2 = vmov %v1419_v20  ;;  %v1595_v19 = vmov %v1588_v62 }
 0x345   : >> { %v1594_v20 = vmov %v1590_v2  ;;  %v536_v19 = vperm.slane (%p408_p6), %v1234_v22, 0  }
 0x346   : > { %s533_s21 = scalar_select %p532_p7, 1, 0 }
 0x347   : > { %v1597_v6 = vmov %v536_v19 }
 0x348   : > { %s534_s22 = scvt.s32.f32 %s533_s21  }
 0x34a   : > { %p787_p8 = scmp.lt.f32.partialorder %s534_s22, 0.5 }
 0x34b   : > { %s1453_s23 = smov (%p787_p8), 0  }
 0x34c   : > { %789 = sbr.rel (!%p787_p8) target bundleno = 1370 (0x55a), region = 107 }
 0x351 LB: >> { %s557_s24 = scvt.s32.f32 %s1133_s15  ;;  %v588_v8 = vstv %s1133_s15  ;;  %vm1598_vm1 = vcmask 1040384   ;;  %p552_p9 = scmp.eq.s32.totalorder %s1133_s15, %s1260_s14  ;;  %s1133_s15 = sphi %s1262_s15, %s1612_s15   ;;  %v1129_v19 = vphi %v536_v19, %v1605_v19   ;;  %v1125_v63 = vphi %v537_v63, %v1604_v63   ;;  %s1121_s22 = sphi %s534_s22, %s1511_s22   ;;  %s1117_s23 = sphi %s1453_s23, %s1603_s23  }
 0x352   : >> { %vm589_vm9 = vcmp.ne.s32.totalorder %v1185_v1, %v588_v8  ;;  %vm590_vm7 = vcmp.ne.s32.totalorder %v1191_v3, %v588_v8  ;;  %vm1599_vm0 = vmmov %vm1598_vm1  ;;  %s660_s16 = sadd.s32 1, %s1117_s23  }
 0x353   : >> { %s558_s25 = sadd.f32 0.5, %s557_s24  ;;  %p546_p1 = scmp.lt.s32.totalorder %s660_s16, 257 }
 0x354   : >> { %s553_s8 = scalar_select %p552_p9, 1, 0 }
 0x355   : >> { %s559_s27 = smul.f32 0.0625, %s558_s25  ;;  %s1603_s23 = smov %s660_s16 }
 0x356   : >> { %s554_s9 = scvt.s32.f32 %s553_s8 }
 0x357   : >> { %s560_s28 = sfloor.f32 %s559_s27 }
 0x358   : >> { %s879_s30 = scvt.f32.s32 %s560_s28  ;;  %s1495_s10 = smax.f32 %s1121_s22, %s554_s9 }
 0x359   : >> { %p556_p10 = scmp.lt.f32.partialorder %s1495_s10, 0.5 }
 0x35a   : >> { %s860_s6 = sshll.u32 %s879_s30, 4  ;;  %v564_v9 = vstv %s879_s30 }
 0x35b   : >> { %s563_s7 = ssub.s32 %s1133_s15, %s860_s6  ;;  %v565_v10 = vsub.s32 %v1238_v31, %v564_v9  ;;  %v566_v11 = vsub.s32 %v1248_v37, %v564_v9 }
 0x35c   : >> { %v575_v20 = vstv %s563_s7 }
 0x35d   : >> { %vm567_vm8 = vcmp.lt.s32.totalorder %v565_v10, 0  ;;  %v568_v21 = vsub.s32 0, %v565_v10  ;;  %vm570_vm2 = vcmp.lt.s32.totalorder %v566_v11, 0  ;;  %v571_v22 = vsub.s32 0, %v566_v11 }
 0x35e   : >> { %v576_v27 = vsub.s32 %v1253_v44, %v575_v20  ;;  %v577_v34 = vsub.s32 %v1258_v48, %v575_v20 }
 0x35f   : >> { %v569_v35 = vsel %vm567_vm8, %v568_v21, %v565_v10  ;;  %v572_v32 = vsel %vm570_vm2, %v571_v22, %v566_v11 }
 0x360   : >> { %vm578_vm3 = vcmp.lt.s32.totalorder %v576_v27, 0  ;;  %v579_v7 = vsub.s32 0, %v576_v27  ;;  %vm573_vm4 = vcmp.le.s32.totalorder %v569_v35, 1  ;;  %vm581_vm5 = vcmp.lt.s32.totalorder %v577_v34, 0 }
 0x361   : >> { %v582_v12 = vsub.s32 0, %v577_v34  ;;  %vm574_vm11 = vcmp.le.s32.totalorder %v572_v32, 1 }
 0x362   : >> { %v580_v13 = vsel %vm578_vm3, %v579_v7, %v576_v27  ;;  %vm1600_vm3 = vmmov %vm1599_vm0 }
 0x363   : >> { %v583_v14 = vsel %vm581_vm5, %v582_v12, %v577_v34  ;;  %vm584_vm6 = vcmp.le.s32.totalorder %v580_v13, 1 }
 0x364   : >> { %vm585_vm12 = vcmp.le.s32.totalorder %v583_v14, 1  ;;  %vm586_vm10 = vmand %vm573_vm4, %vm584_vm6 }
 0x365   : >> { %vm587_vm13 = vmand %vm574_vm11, %vm585_vm12 }
 0x366   : >> { %vm591_vm14 = vmand %vm586_vm10, %vm589_vm9 }
 0x367   : >> { %vm592_vm15 = vmand %vm587_vm13, %vm590_vm7  ;;  %v593_v15 = vsel %vm591_vm14, %v1588_v62, 1e+09 }
 0x368   : >> { %v594_v17 = vsel %vm592_vm15, %v1590_v2, 1e+09  ;;  %v595_v18 = vsel %vm1598_vm1, %v593_v15, inf  ;;  %vm1601_vm4 = vmmov %vm1599_vm0 }
 0x369   : >> { %v596_v23 = vsel %vm1599_vm0, %v594_v17, inf }
 0x36a   : >> { %v597_v24 = vmin.f32 %v595_v18, %v596_v23 }
 0x36c   : >> { %598 = vmin.xlane.f32.xlu0 %v597_v24 }
 0x3df   : >> { %v599_v25 = vpop.xlane.xlu0 %598 }
 0x3e0   : >> { %v600_v28 = vrot.slane %v599_v25, 4 }
 0x3e2   : >> { %v601_v30 = vmin.f32 %v599_v25, %v600_v28 }
 0x3e4   : >> { %v602_v5 = vrot.slane %v601_v30, 2 }
 0x3e6   : >> { %v603_v16 = vmin.f32 %v601_v30, %v602_v5 }
 0x3e8   : >> { %v604_v38 = vrot.slane %v603_v16, 1 }
 0x3ea   : >> { %v605_v39 = vmin.f32 %v603_v16, %v604_v38 }
 0x3ec   : >> { %880 = vpush %v605_v39 }
 0x41d   : >> { %s1498_s11 = spop %880 }
 0x41e   : >> { %p607_p11 = scmp.ge.f32.partialorder %s1498_s11, 1e+08  ;;  %v608_v40 = vstv %s1498_s11 }
 0x41f   : >> { %vm609_vm8 = vcmp.le.f32.partialorder %v593_v15, %v608_v40  ;;  %vm610_vm2 = vcmp.le.f32.partialorder %v594_v17, %v608_v40 }
 0x420   : >> { %v611_v41 = vsel %vm609_vm8, %v1185_v1, 1073741824  ;;  %v612_v42 = vsel %vm610_vm2, %v1191_v3, 1073741824  ;;  %p655_p12 = pnand %p607_p11, %p556_p10  ;;  %p641_p13 = pneg %p607_p11 }
 0x421   : >> { %v613_v43 = vsel %vm1600_vm3, %v611_v41, 2147483647  ;;  %v614_v45 = vsel %vm1601_vm4, %v612_v42, 2147483647 }
 0x422   : >> { %vm615_vm5 = vcmp.lt.s32.totalorder %v613_v43, %v614_v45  ;;  %s863_s12 = scalar_select %p655_p12, 0, 1 }
 0x423   : >> { %v616_v46 = vsel %vm615_vm5, %v613_v43, %v614_v45  ;;  %p1518_p0 = pnand %p641_p13, %p556_p10 }
 0x424   : >> { %v618_v47 = vshra.s32 %v616_v46, 16  ;;  %s658_s13 = scvt.s32.f32 %s863_s12  ;;  %v617_v50 = vand.u32 65535, %v616_v46 }
 0x425   : >> { %s861_s19 = scalar_select %p1518_p0, 0, 1 }
 0x426   : >> { %v620_v49 = vcvt.s32.f32 %v618_v47  ;;  %s1511_s22 = smax.f32 %s658_s13, %s1495_s10   ;;  %v619_v52 = vcvt.s32.f32 %v617_v50 }
 0x427   : >> { %v648_v6 = vstv %s861_s19  ;;  %p547_p2 = scmp.lt.f32.partialorder %s1511_s22, 0.5 }
 0x428   : >> { %621 = vmin.xlane.f32.xlu0 %v620_v49  ;;  %vm649_vm13 = vcmp.eq.s32.totalorder %v648_v6, 1 }
 0x429   : >> { %p548_p3 = pnand %p547_p2, %p546_p1 }
 0x49b   : >> { %v622_v51 = vpop.xlane.xlu0 %621 }
 0x49c   : >> { %vm623_vm11 = vcmp.eq.f32.partialorder %v620_v49, %v622_v51  ;;  %v628_v54 = vcvt.f32.s32 %v622_v51 }
 0x49d   : >> { %v624_v53 = vsel %vm623_vm11, %v619_v52, inf }
 0x49e   : >> { %625 = vmin.xlane.f32.xlu1 %v624_v53  ;;  %v629_v56 = vshll.u32 %v628_v54, 16 }
 0x511   : >> { %v626_v55 = vpop.xlane.xlu1 %625 }
 0x512   : >> { %v627_v57 = vcvt.f32.s32 %v626_v55 }
 0x514   : >> { %v630_v58 = vadd.s32 %v629_v56, %v627_v57 }
 0x516   : >> { %v631_v59 = vrot.slane %v630_v58, 4 }
 0x518   : >> { %vm632_vm6 = vcmp.lt.s32.totalorder %v630_v58, %v631_v59 }
 0x519   : >> { %v633_v60 = vsel %vm632_vm6, %v630_v58, %v631_v59 }
 0x51a   : >> { %v634_v61 = vrot.slane %v633_v60, 2 }
 0x51c   : >> { %vm635_vm9 = vcmp.lt.s32.totalorder %v633_v60, %v634_v61 }
 0x51d   : >> { %v636_v33 = vsel %vm635_vm9, %v633_v60, %v634_v61 }
 0x51e   : >> { %v637_v36 = vrot.slane %v636_v33, 1 }
 0x520   : >> { %vm638_vm12 = vcmp.lt.s32.totalorder %v636_v33, %v637_v36 }
 0x521   : >> { %v639_v4 = vsel %vm638_vm12, %v636_v33, %v637_v36 }
 0x522   : >> { %882 = vpush %v639_v4 }
 0x553   : >> { %s883_s21 = spop %882 }
 0x554   : >> { %v644_v9 = vstv %s883_s21  ;;  %s1612_s15 = smov (!%p1518_p0, %s1133_s15), %s883_s21 }
 0x555   : >> { %vm645_vm10 = vcmp.eq.s32.totalorder %v1185_v1, %v644_v9  ;;  %vm646_vm7 = vcmp.eq.s32.totalorder %v1191_v3, %v644_v9  ;;  %551 = sbr.rel (!%p548_p3) target bundleno = 849 (0x351), region = 113 }
 0x556   : >> { %vm650_vm14 = vmand %vm649_vm13, %vm645_vm10 }
 0x557   : >> { %vm651_vm15 = vmand %vm649_vm13, %vm646_vm7  ;;  %v652_v10 = vsel %vm650_vm14, 1.0, %v1129_v19  }
 0x558   : >> { %v653_v11 = vsel %vm651_vm15, 1.0, %v1125_v63   ;;  %v1605_v19 = vmov %v652_v10  ;;  %v1607_v6 = vmov (%p548_p3), %v652_v10 }
 0x559   : >> { %v1604_v63 = vmov %v653_v11  ;;  %v1606_v4 = vmov (%p548_p3), %v653_v11 }
 0x55a PF: > { %673 = vst [vmem:[#allocation1] sm:$0xff] %v1368_v26  ;;  %v663_v19 = vrot.slane %v1137_v4, 7  ;;  %vm668_vm1 = vcmp.lt.s32.totalorder %v286_v0, 256  ;;  %vm1608_vm0 = vcmask 1040384   ;;  %v1141_v6 = vphi %v1597_v6, %v1607_v6   ;;  %v1137_v4 = vphi %v1596_v4, %v1606_v4  }
 0x55b   : > { %674 = vst [vmem:[#allocation1 + $0x9] sm:$0xff] %v1373_v29 }
 0x55c   : > { %v664_v1 = vsel %vm1608_vm0, %v1141_v6, %v663_v19 }
 0x55d   : > { %670 = vst.msk [vmem:[%s277_s26] sm:$0x3] %vm668_vm1, %v664_v1 }
 0x562   : > { %v676_v3 = vld [vmem:[#allocation1 + $0x1] ss:$9 sm:$0xff] }
 0x563   : > { %678 = vst.msk [vmem:[%s281_s29] sm:$0x3] %vm668_vm1, %v676_v3 }
 0x564 PF: > { %s16_s18 = sadd.s32 1, %s1081_s18  }
 0x565   : > { %p13_p4 = scmp.ge.s32.totalorder %s16_s18, 4  }
 0x567   :  { %15 = sbr.rel (!%p13_p4) target bundleno = 1 (0x1), region = 124 }

</bundles_post_ra>
